<compile_context>
chip_gen: v5e
topology: v5e:2x2
jax: 0.10.0
libtpu: 0.0.40
codegen_flags: <defaults>
</compile_context>

<pallas_src>
import itertools

import numpy as np
import jax
import jax.numpy as jnp
from jax.experimental import pallas as pl
from jax.experimental.pallas import tpu as pltpu


def _round_up(x, m):
    return (x + m - 1) // m * m


# ----------------------------------------------------------------------------
# Fused Pallas kernel: softmax over classes + one-hot gather of target labels.
# Produces cost[t, n] = -softmax(logits_flat[n])[tgt_ids[t]]  (lane-dense in n)
# The last row of `onehot` is all-ones -> that row of the matmul result is the
# softmax denominator, so normalization is a post-matmul divide on the small
# (T_rows, row_tile) slab.
# ----------------------------------------------------------------------------
def _matcher_cost_kernel(onehot_ref, logits_ref, cost_ref):
    x = logits_ref[...].astype(jnp.float32)                     # (rt, K)
    m = jnp.max(x, axis=-1, keepdims=True)
    e = jnp.exp(x - m)                                          # (rt, K)

    # g[t, n] = sum_k onehot[t, k] * e[n, k]  -> (T_rows, rt), n on lanes.
    # Row T_rows-1 of onehot is all-ones, so g[-1, n] = sum_k e[n, k] = denom.
    g = jnp.einsum("tk,nk->tn", onehot_ref[...], e,
                   preferred_element_type=jnp.float32)          # (T_rows, rt)

    denom = g[-1:, :]                                           # (1, rt)
    cost_ref[...] = -(g / denom)                                # exact divide


def _choose_row_tile(n_pad, k, in_itemsize, t_rows):
    """Largest 128-multiple divisor of n_pad within a per-block byte budget,
    keeping >= 2 grid steps when possible (v7x megacore)."""
    per_col_bytes = k * in_itemsize + t_rows * 4
    cap = (4 * 1024 * 1024) // max(per_col_bytes, 1)
    cap = max(128, min(cap, 4096))
    if n_pad >= 256:
        cap = min(cap, n_pad // 2)          # at least 2 tiles -> both v7x TCs
    cap = max(128, (cap // 128) * 128)

    tile = 128
    t = 128
    while t <= min(cap, n_pad):
        if n_pad % t == 0:
            tile = t
        t += 128
    return tile


def matcher_cost_pallas(logits_flat, onehot, row_tile):
    """logits_flat: (N_pad, K) native dtype; onehot: (T_rows, K) f32."""
    n_pad, k = logits_flat.shape
    t_rows = onehot.shape[0]
    num_tiles = n_pad // row_tile

    in_itemsize = jnp.dtype(logits_flat.dtype).itemsize
    footprint = (2 * row_tile * k * in_itemsize      # double-buffered logits
                 + 2 * t_rows * row_tile * 4         # double-buffered output
                 + t_rows * k * 4)                   # resident one-hot
    vmem_limit = int(min(48 * 1024 * 1024, max(8 * 1024 * 1024, 2 * footprint)))

    return pl.pallas_call(
        _matcher_cost_kernel,
        out_shape=jax.ShapeDtypeStruct((t_rows, n_pad), jnp.float32),
        grid_spec=pltpu.PrefetchScalarGridSpec(
            num_scalar_prefetch=0,
            grid=(num_tiles,),
            in_specs=[
                pl.BlockSpec((t_rows, k), lambda i: (0, 0)),    # VMEM-resident
                pl.BlockSpec((row_tile, k), lambda i: (i, 0)),  # streamed rows
            ],
            out_specs=pl.BlockSpec((t_rows, row_tile), lambda i: (0, i)),
        ),
        compiler_params=pltpu.CompilerParams(
            dimension_semantics=("parallel",),
            vmem_limit_bytes=vmem_limit,
        ),
    )(onehot, logits_flat)


# ----------------------------------------------------------------------------
# Device cost computation + host-side slicing into per-image (Q, T_b) matrices
# ----------------------------------------------------------------------------
def _compute_match_costs(pred_logits, targets):
    pred_logits = jnp.asarray(pred_logits)
    B, Q, K = pred_logits.shape
    sizes = [int(np.asarray(t).shape[0]) for t in targets]
    T = int(sum(sizes))

    tgt_ids = (np.concatenate([np.asarray(t).astype(np.int64).ravel()
                               for t in targets])
               if T > 0 else np.zeros((0,), dtype=np.int64))

    # One-hot gather matrix (target rows) + trailing all-ones denominator row.
    t_rows = _round_up(T + 1, 8)
    onehot = np.zeros((t_rows, K), dtype=np.float32)
    if T > 0:
        onehot[np.arange(T), tgt_ids] = 1.0
    onehot[t_rows - 1, :] = 1.0

    N = B * Q
    N_pad = _round_up(N, 128)
    logits_flat = pred_logits.reshape(N, K)          # native dtype, no upcast
    if N_pad != N:                                   # pad at most to 128-mult.
        logits_flat = jnp.pad(logits_flat, ((0, N_pad - N), (0, 0)))

    in_itemsize = jnp.dtype(logits_flat.dtype).itemsize
    row_tile = _choose_row_tile(N_pad, K, in_itemsize, t_rows)

    cost_dev = matcher_cost_pallas(logits_flat, jnp.asarray(onehot), row_tile)
    cost = np.asarray(jax.block_until_ready(cost_dev))  # (t_rows, N_pad)

    per_image = []
    off = 0
    for b, sz in enumerate(sizes):
        c = cost[off:off + sz, b * Q:(b + 1) * Q].T      # (Q, sz)
        per_image.append(np.ascontiguousarray(c, dtype=np.float64))
        off += sz
    return per_image


# ----------------------------------------------------------------------------
# Host: exact linear_sum_assignment (Hungarian algorithm with potentials)
# ----------------------------------------------------------------------------
def _linear_sum_assignment(cost):
    cost = np.asarray(cost, dtype=np.float64)
    nr, nc = cost.shape
    transposed = nr > nc
    if transposed:
        cost = cost.T
    n, m = cost.shape                                  # n <= m
    row4col = np.zeros(m + 1, dtype=np.int64)          # assigned row (1-based)
    way = np.zeros(m + 1, dtype=np.int64)
    u = np.zeros(n + 1, dtype=np.float64)
    v = np.zeros(m + 1, dtype=np.float64)

    for i in range(1, n + 1):
        row4col[0] = i
        j0 = 0
        minv = np.full(m + 1, np.inf)
        used = np.zeros(m + 1, dtype=bool)
        while True:
            used[j0] = True
            i0 = row4col[j0]
            cur = cost[i0 - 1] - u[i0] - v[1:]
            free = ~used[1:]
            upd = free & (cur < minv[1:])
            minv[1:][upd] = cur[upd]
            way[1:][upd] = j0
            reach = np.where(free, minv[1:], np.inf)
            j1 = int(np.argmin(reach)) + 1
            delta = reach[j1 - 1]
            u[row4col[used]] += delta
            v[used] -= delta
            minv[1:][free] -= delta
            j0 = j1
            if row4col[j0] == 0:
                break
        while j0 != 0:
            j1 = way[j0]
            row4col[j0] = row4col[j1]
            j0 = j1

    rows, cols = [], []
    for j in range(1, m + 1):
        if row4col[j] != 0:
            rows.append(row4col[j] - 1)
            cols.append(j - 1)
    rows = np.asarray(rows, dtype=np.int64)
    cols = np.asarray(cols, dtype=np.int64)
    if transposed:
        rows, cols = cols, rows
    order = np.argsort(rows)
    return rows[order], cols[order]


# ----------------------------------------------------------------------------
# Forward pass equivalent of HungarianMatcher.forward
# ----------------------------------------------------------------------------
def hungarian_matcher_forward(pred_logits, targets):
    costs = _compute_match_costs(pred_logits, targets)
    out = []
    for c in costs:
        i, j = _linear_sum_assignment(c)
        out.append((np.asarray(i, dtype=np.int64), np.asarray(j, dtype=np.int64)))
    return out


if __name__ == "__main__":
    key = jax.random.PRNGKey(0)
    B, Q, num_classes = 2, 8, 4
    K = num_classes + 1                                 # +1 no-object class

    pred_logits = jax.random.normal(key, (B, Q, K), dtype=jnp.float32)
    targets = [np.array([0, 2, 1], dtype=np.int64),     # per-image meronym labels
               np.array([3, 1], dtype=np.int64)]

    indices = hungarian_matcher_forward(pred_logits, targets)

    # ---- silent internal validation -------------------------------------
    costs = _compute_match_costs(pred_logits, targets)
    logits_np = np.asarray(pred_logits, dtype=np.float32)
    e_np = np.exp(logits_np - logits_np.max(-1, keepdims=True))
    probs_ref = e_np / e_np.sum(-1, keepdims=True)
    for b, labels in enumerate(targets):
        # (a) kernel cost matches a pure-numpy softmax gather
        np.testing.assert_allclose(
            costs[b], -probs_ref[b][:, labels], rtol=1e-2, atol=1e-5)
        # (b) returned assignment is a valid optimum of the device cost
        i, j = indices[b]
        assert len(i) == len(j) == len(labels)
        assert len(set(i.tolist())) == len(i)
        best = min(
            costs[b][list(rows), np.arange(len(labels))].sum()
            for rows in itertools.permutations(range(Q), len(labels))
        )
        assert float(costs[b][i, j].sum()) <= best + 1e-6

    print("KERNEL_OK")
</pallas_src>

<mosaic_0001>
module attributes {stable_mosaic.version = 11 : i64} {
  func.func @_matcher_cost_kernel(%arg0: i32, %arg1: memref<8x5xf32, #tpu.memory_space<vmem>>, %arg2: memref<128x5xf32, #tpu.memory_space<vmem>>, %arg3: memref<8x128xf32, #tpu.memory_space<vmem>>) attributes {dimension_semantics = [#tpu.dimension_semantics<parallel>], iteration_bounds = array<i64: 1>, scalar_prefetch = 0 : i64, scratch_operands = 0 : i64, tpu.core_type = #tpu.core_type<tc>, window_params = [{pipeline_mode = #tpu.pipeline_mode<synchronous>, transform_indices = @transform_0, window_bounds = array<i64: 8, 5>}, {transform_indices = @transform_1, window_bounds = array<i64: 128, 5>}, {transform_indices = @transform_2, window_bounds = array<i64: 8, 128>}]} {
    %c0 = arith.constant 0 : index
    %c0_0 = arith.constant 0 : index
    %0 = vector.load %arg2[%c0, %c0_0] : memref<128x5xf32, #tpu.memory_space<vmem>>, vector<128x5xf32>
    %cst = arith.constant dense<0xFF800000> : vector<128xf32>
    %1 = vector.multi_reduction <maximumf>, %0, %cst [1] : vector<128x5xf32> to vector<128xf32>
    %2 = vector.shape_cast %1 : vector<128xf32> to vector<128x1xf32>
    %3 = vector.broadcast %2 : vector<128x1xf32> to vector<128x5xf32>
    %4 = arith.subf %0, %3 : vector<128x5xf32>
    %5 = math.exp %4 : vector<128x5xf32>
    %c0_1 = arith.constant 0 : index
    %c0_2 = arith.constant 0 : index
    %6 = vector.load %arg1[%c0_1, %c0_2] : memref<8x5xf32, #tpu.memory_space<vmem>>, vector<8x5xf32>
    "tpu.trace_start"() <{level = 10 : i32, message = "tk,nk->tn"}> : () -> ()
    %cst_3 = arith.constant dense<0.000000e+00> : vector<8x128xf32>
    %7 = tpu.matmul %6, %5, %cst_3 {dimension_numbers = #tpu.dot_dimension_numbers<[1], [1], [0], [0], [0, 0, 1, 0], [], []>} : vector<8x5xf32>, vector<128x5xf32>, vector<8x128xf32> -> vector<8x128xf32>
    "tpu.trace_stop"() : () -> ()
    %8 = vector.extract_strided_slice %7 {offsets = [7, 0], sizes = [1, 128], strides = [1, 1]} : vector<8x128xf32> to vector<1x128xf32>
    %9 = vector.broadcast %8 : vector<1x128xf32> to vector<8x128xf32>
    %10 = arith.divf %7, %9 : vector<8x128xf32>
    %cst_4 = arith.constant 0.000000e+00 : f32
    %11 = vector.broadcast %cst_4 : f32 to vector<8x128xf32>
    %12 = arith.subf %11, %10 : vector<8x128xf32>
    %c0_5 = arith.constant 0 : index
    %c0_6 = arith.constant 0 : index
    %13 = vector.load %arg3[%c0_5, %c0_6] : memref<8x128xf32, #tpu.memory_space<vmem>>, vector<8x128xf32>
    tpu.vector_store %arg3[%c0_5, %c0_6], %12 {strides = array<i32>} : memref<8x128xf32, #tpu.memory_space<vmem>>, vector<8x128xf32>,
    return
  }
  func.func @transform_0(%arg0: i32) -> (i32, i32) {
    %c0_i32 = arith.constant 0 : i32
    %c0_i32_0 = arith.constant 0 : i32
    %c0_i32_1 = arith.constant 0 : i32
    return %c0_i32, %c0_i32_0 : i32, i32
  }
  func.func @transform_1(%arg0: i32) -> (i32, i32) {
    %c0_i32 = arith.constant 0 : i32
    %c0_i32_0 = arith.constant 0 : i32
    return %arg0, %c0_i32 : i32, i32
  }
  func.func @transform_2(%arg0: i32) -> (i32, i32) {
    %c0_i32 = arith.constant 0 : i32
    %c0_i32_0 = arith.constant 0 : i32
    return %c0_i32, %arg0 : i32, i32
  }
}

</mosaic_0001>

<bundles_post_ra>
// kernel: tpu_custom_call.1
= control target key start
LH: loop header
LB: loop body
LE: loop exit
PB: predicated region body
PF: predicated region fallthrough
CT: control target
= control target key end

     0   :  { %vm28_vm0 = vcmask 39936   ;;  %s464_s0 = inlined_call_operand.vmem [shape: f32[8,5], index: 0, kind: input, shape index: {}]   ;;  %s465_s1 = inlined_call_operand.vmem [shape: f32[128,5], index: 1, kind: input, shape index: {}]   ;;  %s466_s2 = inlined_call_operand.hbm [shape: f32[8,128], index: 2, kind: output, shape index: {}]  }
   0x1   :  { %v27_v0 = vld [vmem:[%s465_s1 + $0x78] sm:$0xff]  ;;  %v331_v1 = vld [vmem:[%s465_s1 + $0x68] sm:$0xff]  ;;  %v26_v6 = vld [vmem:[%s465_s1 + $0x70] sm:$0xff] }
   0x2   :  { %v74_v2 = vsel %vm28_vm0, %v27_v0, -inf  ;;  %v68_v3 = vsel %vm28_vm0, %v331_v1, -inf  ;;  %v339_v4 = vld [vmem:[%s465_s1 + $0x58] sm:$0xff]  ;;  %v24_v7 = vld [vmem:[%s465_s1 + $0x60] sm:$0xff]  ;;  %v352_v8 = vld [vmem:[%s465_s1 + $0x50] sm:$0xff] }
   0x3   :  { %75 = vmax.xlane.f32.xlu0 %v74_v2  ;;  %69 = vmax.xlane.f32.xlu1 %v68_v3  ;;  %v62_v5 = vsel %vm28_vm0, %v339_v4, -inf }
   0x4   :  { %63 = vmax.xlane.f32.xlu2 %v62_v5 }
   0x5   :  { %7 = vsyncpa [#allocation3], 0  ;;  %v71_v9 = vsel %vm28_vm0, %v26_v6, -inf  ;;  %v65_v10 = vsel %vm28_vm0, %v24_v7, -inf  ;;  %v59_v11 = vsel %vm28_vm0, %v352_v8, -inf  ;;  %v361_v12 = vld [vmem:[%s465_s1 + $0x48] sm:$0xff] }
   0x6   :  { %v366_v13 = vld [vmem:[%s465_s1 + $0x40] sm:$0xff]  ;;  %v371_v14 = vld [vmem:[%s465_s1 + $0x38] sm:$0xff]  ;;  %v56_v15 = vsel %vm28_vm0, %v361_v12, -inf  ;;  %v382_v18 = vld [vmem:[%s465_s1 + $0x30] sm:$0xff]  ;;  %s222_s17 = sshll.u32 %s466_s2, 4  ;;  %s223_s17 = int_to_ptr.hbm [resolvable:$true] %s222_s17 }
   0x7   :  { %v53_v16 = vsel %vm28_vm0, %v366_v13, -inf  ;;  %v50_v17 = vsel %vm28_vm0, %v371_v14, -inf  ;;  %v387_v19 = vld [vmem:[%s465_s1 + $0x28] sm:$0xff]  ;;  %v392_v20 = vld [vmem:[%s465_s1 + $0x20] sm:$0xff]  ;;  %v47_v21 = vsel %vm28_vm0, %v382_v18, -inf  ;;  %v403_v24 = vld [vmem:[%s465_s1 + $0x18] sm:$0xff] }
   0x8   :  { %v44_v22 = vsel %vm28_vm0, %v387_v19, -inf  ;;  %v41_v23 = vsel %vm28_vm0, %v392_v20, -inf  ;;  %v408_v25 = vld [vmem:[%s465_s1 + $0x10] sm:$0xff]  ;;  %v413_v26 = vld [vmem:[%s465_s1 + $0x8] sm:$0xff]  ;;  %v38_v27 = vsel %vm28_vm0, %v403_v24, -inf  ;;  %v424_v30 = vld [vmem:[%s465_s1] sm:$0xff] }
   0x9   :  { %v35_v28 = vsel %vm28_vm0, %v408_v25, -inf  ;;  %v32_v29 = vsel %vm28_vm0, %v413_v26, -inf  ;;  %v29_v31 = vsel %vm28_vm0, %v424_v30, -inf }
   0xb   :  { %72 = vmax.xlane.f32.xlu0 %v71_v9  ;;  %66 = vmax.xlane.f32.xlu1 %v65_v10 }
   0xc   :  { %60 = vmax.xlane.f32.xlu2 %v59_v11 }
  0x13   :  { %57 = vmax.xlane.f32.xlu0 %v56_v15  ;;  %54 = vmax.xlane.f32.xlu1 %v53_v16 }
  0x14   :  { %51 = vmax.xlane.f32.xlu2 %v50_v17 }
  0x1b   :  { %48 = vmax.xlane.f32.xlu0 %v47_v21  ;;  %45 = vmax.xlane.f32.xlu1 %v44_v22 }
  0x1c   :  { %42 = vmax.xlane.f32.xlu2 %v41_v23 }
  0x23   :  { %39 = vmax.xlane.f32.xlu0 %v38_v27  ;;  %36 = vmax.xlane.f32.xlu1 %v35_v28 }
  0x24   :  { %33 = vmax.xlane.f32.xlu2 %v32_v29 }
  0x2b   :  { %30 = vmax.xlane.f32.xlu0 %v29_v31 }
  0x76   :  { %v76_v32 = vpop.xlane.xlu0 %75  ;;  %v70_v33 = vpop.xlane.xlu1 %69 }
  0x77   :  { %v92_v34 = vsub.f32 %v27_v0, %v76_v32  ;;  %v64_v36 = vpop.xlane.xlu2 %63  ;;  %v90_v40 = vsub.f32 %v331_v1, %v70_v33 }
  0x78   :  { %v88_v47 = vsub.f32 %v339_v4, %v64_v36 }
  0x79   :  { %v123_v35 = vmul.f32 1.442695, %v92_v34  ;;  %v119_v44 = vmul.f32 1.442695, %v90_v40 }
  0x7a   :  { %v115_v51 = vmul.f32 1.442695, %v88_v47 }
  0x7b   :  { %249 = vpow2.f32 %v123_v35 }
  0x7e   :  { %v73_v37 = vpop.xlane.xlu0 %72  ;;  %v67_v38 = vpop.xlane.xlu1 %66 }
  0x7f   :  { %v91_v39 = vsub.f32 %v26_v6, %v73_v37  ;;  %v89_v43 = vsub.f32 %v24_v7, %v67_v38  ;;  %v61_v46 = vpop.xlane.xlu2 %60 }
  0x80   :  { %v87_v49 = vsub.f32 %v352_v8, %v61_v46 }
  0x81   :  { %v250_v41 = vpop.eup %249  ;;  %v121_v42 = vmul.f32 1.442695, %v91_v39  ;;  %v117_v45 = vmul.f32 1.442695, %v89_v43 }
  0x82   :  { %231 = vmatpush.xpose.msk.msra.mxu0 %vm28_vm0, %v250_v41  ;;  %v113_v53 = vmul.f32 1.442695, %v87_v49 }
  0x83   :  { %251 = vpow2.f32 %v121_v42 }
  0x84   :  { %253 = vpow2.f32 %v119_v44 }
  0x85   :  { %255 = vpow2.f32 %v117_v45 }
  0x86   :  { %v58_v50 = vpop.xlane.xlu0 %57  ;;  %v55_v55 = vpop.xlane.xlu1 %54  ;;  %257 = vpow2.f32 %v115_v51 }
  0x87   :  { %v86_v54 = vsub.f32 %v361_v12, %v58_v50  ;;  %259 = vpow2.f32 %v113_v53  ;;  %v85_v58 = vsub.f32 %v366_v13, %v55_v55  ;;  %v52_v59 = vpop.xlane.xlu2 %51 }
  0x88   :  { %v84_v62 = vsub.f32 %v371_v14, %v52_v59 }
  0x89   :  { %v252_v48 = vpop.eup %251  ;;  %v111_v57 = vmul.f32 1.442695, %v86_v54  ;;  %v109_v61 = vmul.f32 1.442695, %v85_v58 }
  0x8a   :  { %232 = vmatpush.xpose.msk.msra.mxu0 %vm28_vm0, %v252_v48  ;;  %v254_v52 = vpop.eup %253  ;;  %v107_v1 = vmul.f32 1.442695, %v84_v62 }
  0x8b   :  { %v256_v56 = vpop.eup %255  ;;  %261 = vpow2.f32 %v111_v57 }
  0x8c   :  { %v258_v60 = vpop.eup %257  ;;  %263 = vpow2.f32 %v109_v61 }
  0x8d   :  { %v260_v0 = vpop.eup %259  ;;  %265 = vpow2.f32 %v107_v1 }
  0x8e   :  { %233 = vmatpush.xpose.msk.msra.mxu0 %vm28_vm0, %v254_v52  ;;  %v49_v63 = vpop.xlane.xlu0 %48  ;;  %v46_v3 = vpop.xlane.xlu1 %45 }
  0x8f   :  { %v83_v2 = vsub.f32 %v382_v18, %v49_v63  ;;  %v82_v6 = vsub.f32 %v387_v19, %v46_v3  ;;  %v43_v7 = vpop.xlane.xlu2 %42 }
  0x90   :  { %v81_v10 = vsub.f32 %v392_v20, %v43_v7 }
  0x91   :  { %v262_v4 = vpop.eup %261  ;;  %v105_v5 = vmul.f32 1.442695, %v83_v2  ;;  %v103_v9 = vmul.f32 1.442695, %v82_v6 }
  0x92   :  { %234 = vmatpush.xpose.msk.msra.mxu0 %vm28_vm0, %v256_v56  ;;  %v264_v8 = vpop.eup %263  ;;  %v101_v13 = vmul.f32 1.442695, %v81_v10 }
  0x93   :  { %267 = vpow2.f32 %v105_v5  ;;  %v266_v12 = vpop.eup %265 }
  0x94   :  { %269 = vpow2.f32 %v103_v9 }
  0x95   :  { %271 = vpow2.f32 %v101_v13 }
  0x96   :  { %235 = vmatpush.xpose.msk.msra.mxu0 %vm28_vm0, %v258_v60  ;;  %v40_v11 = vpop.xlane.xlu0 %39  ;;  %v37_v15 = vpop.xlane.xlu1 %36 }
  0x97   :  { %v80_v14 = vsub.f32 %v403_v24, %v40_v11  ;;  %v79_v18 = vsub.f32 %v408_v25, %v37_v15  ;;  %v34_v19 = vpop.xlane.xlu2 %33 }
  0x98   :  { %v78_v22 = vsub.f32 %v413_v26, %v34_v19 }
  0x99   :  { %v268_v16 = vpop.eup %267  ;;  %v99_v17 = vmul.f32 1.442695, %v80_v14  ;;  %v97_v21 = vmul.f32 1.442695, %v79_v18 }
  0x9a   :  { %236 = vmatpush.xpose.msk.msra.mxu0 %vm28_vm0, %v260_v0  ;;  %v270_v20 = vpop.eup %269  ;;  %v95_v27 = vmul.f32 1.442695, %v78_v22 }
  0x9b   :  { %273 = vpow2.f32 %v99_v17  ;;  %v272_v24 = vpop.eup %271 }
  0x9c   :  { %275 = vpow2.f32 %v97_v21 }
  0x9d   :  { %277 = vpow2.f32 %v95_v27 }
  0x9e   :  { %237 = vmatpush.xpose.msk.msra.mxu0 %vm28_vm0, %v262_v4  ;;  %v31_v23 = vpop.xlane.xlu0 %30 }
  0x9f   :  { %v77_v28 = vsub.f32 %v424_v30, %v31_v23  ;;  %v125_v30 = vld [vmem:[%s464_s0] sm:$0xff]  ;;  %s309_s0 = smov [#allocation2]  }
  0xa0   :  { %s220_s14 = sshll.u32 %s309_s0, 4  ;;  %s221_s14 = int_to_ptr.vmem [resolvable:$true] %s220_s14 }
  0xa1   :  { %v274_v29 = vpop.eup %273  ;;  %v93_v25 = vmul.f32 1.442695, %v77_v28 }
  0xa2   :  { %238 = vmatpush.xpose.msk.msra.mxu0 %vm28_vm0, %v264_v8  ;;  %v276_v31 = vpop.eup %275 }
  0xa3   :  { %279 = vpow2.f32 %v93_v25  ;;  %v278_v26 = vpop.eup %277 }
  0xa6   :  { %239 = vmatpush.xpose.msk.msra.mxu0 %vm28_vm0, %v266_v12 }
  0xa9   :  { %v280_v32 = vpop.eup %279 }
  0xaa   :  { %240 = vmatpush.xpose.msk.msra.mxu0 %vm28_vm0, %v268_v16 }
  0xae   :  { %241 = vmatpush.xpose.msk.msra.mxu0 %vm28_vm0, %v270_v20 }
  0xb2   :  { %242 = vmatpush.xpose.msk.msra.mxu0 %vm28_vm0, %v272_v24 }
  0xb6   :  { %243 = vmatpush.xpose.msk.msra.mxu0 %vm28_vm0, %v274_v29 }
  0xba   :  { %244 = vmatpush.xpose.msk.msra.mxu0 %vm28_vm0, %v276_v31 }
  0xbe   :  { %245 = vmatpush.xpose.msk.msra.mxu0 %vm28_vm0, %v278_v26 }
  0xc2   :  { %246 = vmatpush.xpose.msk.msra.mxu0 %vm28_vm0, %v280_v32 }
  0xc5   :  { %247 = vmatmul.msk.f32.vlgmr.msra.gmra.mxu0 %vm28_vm0, %v125_v30 }
 0x142   :  { %v194_v33 = vpop.f32.mrf.mxu0 }
 0x143   :  { %v197_v34 = vperm.slane %v194_v33, 7 }
 0x145   :  { %281 = vrcp.f32 %v197_v34  ;;  %v209_v38 = vand.u32 2147483648, %v197_v34  ;;  %v207_v40 = vand.u32 2147483647, %v197_v34  ;;  %vm203_vm2 = vweird.f32 %v197_v34 }
 0x147   :  { %v210_v42 = vor.u32 1.1754944e-38, %v209_v38  ;;  %vm208_vm4 = vcmp.eq.f32.partialorder %v207_v40, 8.507059e+37 }
 0x14b   :  { %v282_v35 = vpop.eup %281 }
 0x14c   :  { %v199_v36 = vmul.f32 %v282_v35, %v197_v34  ;;  %vm204_vm1 = vweird.f32 %v282_v35 }
 0x14d   :  { %vm205_vm3 = vmor %vm203_vm2, %vm204_vm1 }
 0x14e   :  { %v200_v37 = vsub.f32 1.0, %v199_v36 }
 0x150   :  { %v201_v39 = vmul.f32 %v282_v35, %v200_v37 }
 0x152   :  { %v202_v41 = vadd.f32 %v282_v35, %v201_v39 }
 0x154   :  { %v206_v43 = vsel %vm205_vm3, %v282_v35, %v202_v41 }
 0x155   :  { %v211_v44 = vsel %vm208_vm4, %v210_v42, %v206_v43 }
 0x156   :  { %v212_v45 = vmul.f32 %v211_v44, %v194_v33 }
 0x158   :  { %v213_v46 = vsub.f32 0.0, %v212_v45 }
 0x15a   :  { %214 = vst [vmem:[#allocation2] sm:$0xff] %v213_v46 }
 0x15b   :  { %225 = dma.vmem_to_hbm [thread:$0]  %s221_s14, 128, %s223_s17, [#allocation3]  }
 0x15c   :  { %307 = dma.done.wait [#allocation3], 128  }
 0x15d   :  { %308 = vsyncadd [#allocation3], 4294967168 }
 0x15e   :  { %230 = vsyncpa [#allocation3], 1 }

</bundles_post_ra>
